<compile_context>
chip_gen: v7x
topology: tpu7x:2x2x1
jax: 0.10.0
libtpu: 0.0.40
codegen_flags: <defaults>
</compile_context>

<pallas_src>
import functools

import jax
import jax.numpy as jnp
from jax.experimental import pallas as pl
from jax.experimental.pallas import tpu as pltpu


def _pick_tile(n, align, cap):
    """Largest `align`-aligned divisor of n that is <= cap; falls back to the full dim."""
    if n <= cap or n % align:
        return n
    t = cap - (cap % align)
    while t >= align:
        if n % t == 0:
            return t
        t -= align
    return n


# ----------------------------------------------------------------------------
# Stage 1: XW = seq @ W  (once per distinct seq)
# ----------------------------------------------------------------------------
def _xw_kernel(seq_ref, w_ref, xw_ref):
    xw_ref[...] = jnp.dot(seq_ref[...], w_ref[...],
                          preferred_element_type=jnp.float32)


def seq_times_w(seq_stack, w):
    S, B, N, F = seq_stack.shape
    H = w.shape[1]
    tn = _pick_tile(N, 8, 256)
    return pl.pallas_call(
        _xw_kernel,
        out_shape=jax.ShapeDtypeStruct((S, B, N, H), jnp.float32),
        grid=(S, B, N // tn),
        in_specs=[
            pl.BlockSpec((None, None, tn, F), lambda s, b, i: (s, b, i, 0)),
            pl.BlockSpec((F, H), lambda s, b, i: (0, 0)),
        ],
        out_specs=pl.BlockSpec((None, None, tn, H), lambda s, b, i: (s, b, i, 0)),
        compiler_params=pltpu.CompilerParams(
            dimension_semantics=("parallel", "parallel", "parallel")),
    )(seq_stack, w)


# ----------------------------------------------------------------------------
# Stage 2: fused GCN (adj @ XW + bias -> PReLU) + AvgReadout + Sigmoid for all
#          four views in a single pallas_call.
#   grid = (view, batch, row-tile i, reduction-tile k)
#   scalar-prefetched seq_idx/adj_idx pick the stacked seq / adjacency per view.
# ----------------------------------------------------------------------------
def _gcn_fused_kernel(seq_idx_ref, adj_idx_ref,              # scalar prefetch (SMEM)
                      alpha_ref, xw_ref, adj_ref, bias_ref,  # inputs
                      h_ref, c_ref,                          # outputs
                      acc_ref, csum_ref,                     # VMEM scratch
                      *, inv_n):
    del seq_idx_ref, adj_idx_ref  # consumed only by the index_maps
    i = pl.program_id(2)
    k = pl.program_id(3)
    ni = pl.num_programs(2)
    nk = pl.num_programs(3)

    @pl.when(k == 0)
    def _zero_acc():
        acc_ref[...] = jnp.zeros_like(acc_ref)

    @pl.when(jnp.logical_and(i == 0, k == 0))
    def _zero_csum():
        csum_ref[...] = jnp.zeros_like(csum_ref)

    acc_ref[...] += jnp.dot(adj_ref[...], xw_ref[...],
                            preferred_element_type=jnp.float32)

    @pl.when(k == nk - 1)
    def _epilogue():
        alpha = alpha_ref[0]                               # PReLU slope (scalar, SMEM)
        pre = acc_ref[...] + bias_ref[...]
        act = jnp.where(pre >= 0.0, pre, alpha * pre)
        h_ref[...] = act
        csum_ref[...] += jnp.sum(act, axis=0, keepdims=True)

    @pl.when(jnp.logical_and(i == ni - 1, k == nk - 1))
    def _readout():
        c_ref[...] = jax.nn.sigmoid(csum_ref[...] * inv_n)  # sigmoid(mean over nodes)


def gcn_fused(seq_idx, adj_idx, alpha, xw, adj_stack, bias):
    S, B, N, H = xw.shape
    V = int(seq_idx.shape[0])
    tn = _pick_tile(N, 8, 256)      # adjacency row tile (sublane aligned)
    tk = _pick_tile(N, 128, 512)    # adjacency col / reduction tile (lane aligned)

    grid_spec = pltpu.PrefetchScalarGridSpec(
        num_scalar_prefetch=2,
        grid=(V, B, N // tn, N // tk),
        in_specs=[
            pl.BlockSpec((1,), lambda v, b, i, k, si, ai: (0,),
                         memory_space=pltpu.MemorySpace.SMEM),
            pl.BlockSpec((None, None, tk, H),
                         lambda v, b, i, k, si, ai: (si[v], b, k, 0)),
            pl.BlockSpec((None, None, tn, tk),
                         lambda v, b, i, k, si, ai: (ai[v], b, i, k)),
            pl.BlockSpec((1, H), lambda v, b, i, k, si, ai: (0, 0)),
        ],
        out_specs=[
            pl.BlockSpec((None, None, tn, H),
                         lambda v, b, i, k, si, ai: (v, b, i, 0)),
            pl.BlockSpec((None, None, 1, H),
                         lambda v, b, i, k, si, ai: (v, b, 0, 0)),
        ],
        scratch_shapes=[
            pltpu.VMEM((tn, H), jnp.float32),
            pltpu.VMEM((1, H), jnp.float32),
        ],
    )
    h, c = pl.pallas_call(
        functools.partial(_gcn_fused_kernel, inv_n=1.0 / N),
        grid_spec=grid_spec,
        out_shape=(
            jax.ShapeDtypeStruct((V, B, N, H), jnp.float32),
            jax.ShapeDtypeStruct((V, B, 1, H), jnp.float32),
        ),
        compiler_params=pltpu.CompilerParams(
            dimension_semantics=("parallel", "parallel", "arbitrary", "arbitrary")),
    )(seq_idx, adj_idx, alpha, xw, adj_stack, bias)
    return h, c[:, :, 0, :]


# ----------------------------------------------------------------------------
# Stage 3: merged discriminator.
#   vm = [c_1, c_3, c_0] @ Wb^T  (Wb pre-transposed in the wrapper)
#   scores row 0: h_0 . (Wb c_1 + Wb c_3)     row 1: h_2 . (Wb c_1 + Wb c_3)
#   scores row 2: h_1 . (Wb c_0)              row 3: h_3 . (Wb c_0)
#   (bias and the randperm corruption gather are applied in the wrapper.)
# ----------------------------------------------------------------------------
def _disc_kernel(c_ref, wbt_ref, h_ref, s_ref):
    vm = jnp.dot(c_ref[...], wbt_ref[...], preferred_element_type=jnp.float32)  # (3, H)
    va = vm[0:1, :] + vm[1:2, :]     # Wb@c_1 + Wb@c_3
    v0 = vm[2:3, :]                  # Wb@c_0
    s_ref[0:1, :] = jnp.sum(h_ref[0] * va, axis=-1)[None, :]
    s_ref[1:2, :] = jnp.sum(h_ref[1] * va, axis=-1)[None, :]
    s_ref[2:3, :] = jnp.sum(h_ref[2] * v0, axis=-1)[None, :]
    s_ref[3:4, :] = jnp.sum(h_ref[3] * v0, axis=-1)[None, :]


def disc_scores(c_stack, wbt, h_all):
    B, _, H = c_stack.shape
    V, _, N, _ = h_all.shape
    tn = _pick_tile(N, 128, 512)
    return pl.pallas_call(
        _disc_kernel,
        out_shape=jax.ShapeDtypeStruct((B, 4, N), jnp.float32),
        grid=(B, N // tn),
        in_specs=[
            pl.BlockSpec((None, 3, H), lambda b, i: (b, 0, 0)),
            pl.BlockSpec((H, H), lambda b, i: (0, 0)),
            pl.BlockSpec((4, None, tn, H), lambda b, i: (0, b, i, 0)),
        ],
        out_specs=pl.BlockSpec((None, 4, tn), lambda b, i: (b, 0, i)),
        compiler_params=pltpu.CompilerParams(
            dimension_semantics=("parallel", "parallel")),
    )(c_stack, wbt, h_all)


# ----------------------------------------------------------------------------
# DGI forward (glue in plain JAX; hot paths above in Pallas)
# ----------------------------------------------------------------------------
def dgi_forward(params, seq1, seq2, seq3, seq4, adj, aug_adj1, aug_adj2,
                msk=None, samp_bias1=None, samp_bias2=None, *,
                aug_type, perm_key):
    del msk, samp_bias1, samp_bias2  # None in this configuration (see TODOs above)
    w, bias, alpha = params["gcn_w"], params["gcn_b"], params["prelu_alpha"]
    wb, bb = params["disc_w"], params["disc_b"]

    # View order: [h_0=(seq1,adj), h_2=(seq2,adj), h_1, h_3]; distinct seqs/adjs are
    # stacked once and selected per view via scalar prefetch (dedups seq@W for 'edge').
    if aug_type == "edge":
        seqs, adjs = [seq1, seq2], [adj, aug_adj1, aug_adj2]
        seq_idx, adj_idx = [0, 1, 0, 0], [0, 0, 1, 2]
    elif aug_type == "mask":
        seqs, adjs = [seq1, seq2, seq3, seq4], [adj]
        seq_idx, adj_idx = [0, 1, 2, 3], [0, 0, 0, 0]
    elif aug_type in ("node", "subgraph"):
        seqs, adjs = [seq1, seq2, seq3, seq4], [adj, aug_adj1, aug_adj2]
        seq_idx, adj_idx = [0, 1, 2, 3], [0, 0, 1, 2]
    else:
        raise AssertionError("unknown aug_type")

    seq_stack = jnp.stack(seqs, axis=0)                 # (S, B, N, F)
    adj_stack = jnp.stack(adjs, axis=0)                 # (A, B, N, N)
    seq_idx = jnp.asarray(seq_idx, jnp.int32)
    adj_idx = jnp.asarray(adj_idx, jnp.int32)

    xw = seq_times_w(seq_stack, w)                      # (S, B, N, H)
    h_all, c_all = gcn_fused(seq_idx, adj_idx, alpha, xw, adj_stack, bias)
    # h_all: (4, B, N, H) = [h_0, h_2, h_1, h_3]; c_all: (4, B, H) = [c_0, c_2, c_1, c_3]
    # (c_2 is a free by-product of the fused readout; the reference computes it unused.)

    c_stack = jnp.stack([c_all[2], c_all[3], c_all[0]], axis=1)   # (B, 3, H) = [c_1, c_3, c_0]
    scores = disc_scores(c_stack, wb.T, h_all)          # (B, 4, N)
    sa0, sa2 = scores[:, 0], scores[:, 1]               # h_0 / h_2 vs Wb(c_1)+Wb(c_3)
    s1, s3 = scores[:, 2], scores[:, 3]                 # h_1 / h_3 vs Wb(c_0)

    # torch.randperm node-shuffle corruption (deterministic key).  Permuting rows of h
    # only permutes its per-node bilinear scores, so the gather acts on (B, N) vectors
    # instead of materializing corrupted (B, N, H) tensors.
    N = h_all.shape[2]
    k1, k2 = jax.random.split(perm_key)
    perm1 = jax.random.permutation(k1, N)
    perm3 = jax.random.permutation(k2, N)

    two_b = 2.0 * bb[0]
    ret_a = jnp.concatenate([sa0, sa2], axis=-1) + two_b                       # ret1 + ret2
    ret_b = jnp.concatenate([s1 + s3, s3[:, perm3] + s1[:, perm1]],
                            axis=-1) + two_b                                   # ret3 + ret4
    return ret_a, ret_b


# ----------------------------------------------------------------------------
# Pure-JAX reference (for a numerical self-check of the refactor)
# ----------------------------------------------------------------------------
def _reference_forward(params, seq1, seq2, seq3, seq4, adj, aug_adj1, aug_adj2,
                       *, aug_type, perm_key):
    w, bias, alpha = params["gcn_w"], params["gcn_b"], params["prelu_alpha"]
    wb, bb = params["disc_w"], params["disc_b"]
    hi = jax.lax.Precision.HIGHEST

    def gcn_ref(seq, a):
        xw = jnp.einsum("bnf,fh->bnh", seq, w, precision=hi)
        pre = jnp.einsum("bnm,bmh->bnh", a, xw, precision=hi) + bias[None]
        return jnp.where(pre >= 0.0, pre, alpha[0] * pre)

    def read_sig(h):
        return jax.nn.sigmoid(jnp.mean(h, axis=1))

    def disc_ref(c, h_pl, h_mi):
        v = jnp.einsum("bh,ih->bi", c, wb, precision=hi)
        s1 = jnp.einsum("bnh,bh->bn", h_pl, v, precision=hi) + bb[0]
        s2 = jnp.einsum("bnh,bh->bn", h_mi, v, precision=hi) + bb[0]
        return jnp.concatenate([s1, s2], axis=1)

    h_0 = gcn_ref(seq1, adj)
    h_2 = gcn_ref(seq2, adj)
    if aug_type == "edge":
        h_1, h_3 = gcn_ref(seq1, aug_adj1), gcn_ref(seq1, aug_adj2)
    elif aug_type == "mask":
        h_1, h_3 = gcn_ref(seq3, adj), gcn_ref(seq4, adj)
    else:
        h_1, h_3 = gcn_ref(seq3, aug_adj1), gcn_ref(seq4, aug_adj2)
    c_1, c_3, c_0 = read_sig(h_1), read_sig(h_3), read_sig(h_0)
    ret1 = disc_ref(c_1, h_0, h_2)
    ret2 = disc_ref(c_3, h_0, h_2)
    N = h_1.shape[1]
    k1, k2 = jax.random.split(perm_key)
    perm1 = jax.random.permutation(k1, N)
    perm3 = jax.random.permutation(k2, N)
    ret3 = disc_ref(c_0, h_1, h_3[:, perm3])
    ret4 = disc_ref(c_0, h_3, h_1[:, perm1])
    return ret1 + ret2, ret3 + ret4


# ----------------------------------------------------------------------------
# Deterministic parameter init (shapes from DGI.__init__: GCN(n_in, n_h), Bilinear(n_h,n_h,1))
# ----------------------------------------------------------------------------
def init_params(key, n_in, n_h):
    k1, k2 = jax.random.split(key)
    gcn_w = (jax.random.normal(k1, (n_in, n_h), jnp.float32)
             * (2.0 / (n_in + n_h)) ** 0.5)              # xavier-ish, already transposed
    gcn_b = jnp.zeros((1, n_h), jnp.float32)             # GCN bias init 0
    prelu_alpha = jnp.array([0.25], jnp.float32)         # nn.PReLU default
    disc_w = (jax.random.normal(k2, (n_h, n_h), jnp.float32)
              * (2.0 / (2 * n_h)) ** 0.5)                # Bilinear weight (out=1 squeezed)
    disc_b = jnp.zeros((1,), jnp.float32)                # Bilinear bias init 0
    return dict(gcn_w=gcn_w, gcn_b=gcn_b, prelu_alpha=prelu_alpha,
                disc_w=disc_w, disc_b=disc_b)


if __name__ == "__main__":
    B, N, n_in, n_h = 1, 16, 8, 32

    key = jax.random.PRNGKey(0)
    kp, k1, k2, k3, k4, ka, ka1, ka2, kperm = jax.random.split(key, 9)

    params = init_params(kp, n_in, n_h)

    seq1 = jax.random.normal(k1, (B, N, n_in), jnp.float32)
    seq2 = jax.random.normal(k2, (B, N, n_in), jnp.float32)
    seq3 = jax.random.normal(k3, (B, N, n_in), jnp.float32)
    seq4 = jax.random.normal(k4, (B, N, n_in), jnp.float32)

    def rand_adj(k):
        a = jax.random.uniform(k, (B, N, N), jnp.float32)
        a = a + jnp.eye(N, dtype=jnp.float32)[None]
        return a / jnp.sum(a, axis=-1, keepdims=True)    # row-normalized dense adjacency

    adj = rand_adj(ka)
    aug_adj1 = rand_adj(ka1)
    aug_adj2 = rand_adj(ka2)

    fwd = jax.jit(functools.partial(dgi_forward, aug_type="edge"))
    ret_a, ret_b = fwd(params, seq1, seq2, seq3, seq4, adj, aug_adj1, aug_adj2,
                       perm_key=kperm)
    jax.block_until_ready((ret_a, ret_b))

    assert ret_a.shape == (B, 2 * N) and ret_b.shape == (B, 2 * N)
    assert jnp.all(jnp.isfinite(ret_a)) and jnp.all(jnp.isfinite(ret_b))

    ref_a, ref_b = _reference_forward(params, seq1, seq2, seq3, seq4,
                                      adj, aug_adj1, aug_adj2,
                                      aug_type="edge", perm_key=kperm)
    assert jnp.allclose(ret_a, ref_a, rtol=1e-2, atol=1e-2)
    assert jnp.allclose(ret_b, ref_b, rtol=1e-2, atol=1e-2)

    print("KERNEL_OK")
</pallas_src>

<mosaic_0001>
module attributes {stable_mosaic.version = 11 : i64} {
  func.func @_xw_kernel(%arg0: i32, %arg1: i32, %arg2: i32, %arg3: memref<1x1x16x8xf32, #tpu.memory_space<vmem>>, %arg4: memref<8x32xf32, #tpu.memory_space<vmem>>, %arg5: memref<1x1x16x32xf32, #tpu.memory_space<vmem>>) attributes {dimension_semantics = [#tpu.dimension_semantics<parallel>, #tpu.dimension_semantics<parallel>, #tpu.dimension_semantics<parallel>], iteration_bounds = array<i64: 2, 1, 1>, scalar_prefetch = 0 : i64, scratch_operands = 0 : i64, tpu.core_type = #tpu.core_type<tc>, window_params = [{transform_indices = @transform_0, window_bounds = array<i64: 1, 1, 16, 8>}, {pipeline_mode = #tpu.pipeline_mode<synchronous>, transform_indices = @transform_1, window_bounds = array<i64: 8, 32>}, {transform_indices = @transform_2, window_bounds = array<i64: 1, 1, 16, 32>}]} {
    %c0 = arith.constant 0 : index
    %c0_0 = arith.constant 0 : index
    %c0_1 = arith.constant 0 : index
    %c0_2 = arith.constant 0 : index
    %0 = vector.load %arg3[%c0, %c0_0, %c0_1, %c0_2] : memref<1x1x16x8xf32, #tpu.memory_space<vmem>>, vector<1x1x16x8xf32>
    %1 = vector.shape_cast %0 : vector<1x1x16x8xf32> to vector<16x8xf32>
    %c0_3 = arith.constant 0 : index
    %c0_4 = arith.constant 0 : index
    %2 = vector.load %arg4[%c0_3, %c0_4] : memref<8x32xf32, #tpu.memory_space<vmem>>, vector<8x32xf32>
    %cst = arith.constant dense<0.000000e+00> : vector<16x32xf32>
    %3 = tpu.matmul %1, %2, %cst {dimension_numbers = #tpu.dot_dimension_numbers<[1], [0], [0], [1], [0, 0, 1, 1], [], []>} : vector<16x8xf32>, vector<8x32xf32>, vector<16x32xf32> -> vector<16x32xf32>
    %c0_5 = arith.constant 0 : index
    %c0_6 = arith.constant 0 : index
    %c0_7 = arith.constant 0 : index
    %c0_8 = arith.constant 0 : index
    %4 = vector.load %arg5[%c0_5, %c0_6, %c0_7, %c0_8] : memref<1x1x16x32xf32, #tpu.memory_space<vmem>>, vector<1x1x16x32xf32>
    %5 = vector.shape_cast %4 : vector<1x1x16x32xf32> to vector<16x32xf32>
    %6 = vector.shape_cast %3 : vector<16x32xf32> to vector<1x1x16x32xf32>
    tpu.vector_store %arg5[%c0_5, %c0_6, %c0_7, %c0_8], %6 {strides = array<i32>} : memref<1x1x16x32xf32, #tpu.memory_space<vmem>>, vector<1x1x16x32xf32>,
    return
  }
  func.func @transform_0(%arg0: i32, %arg1: i32, %arg2: i32) -> (i32, i32, i32, i32) {
    %c0_i32 = arith.constant 0 : i32
    %c0_i32_0 = arith.constant 0 : i32
    return %arg0, %arg1, %arg2, %c0_i32 : i32, i32, i32, i32
  }
  func.func @transform_1(%arg0: i32, %arg1: i32, %arg2: i32) -> (i32, i32) {
    %c0_i32 = arith.constant 0 : i32
    %c0_i32_0 = arith.constant 0 : i32
    %c0_i32_1 = arith.constant 0 : i32
    return %c0_i32, %c0_i32_0 : i32, i32
  }
  func.func @transform_2(%arg0: i32, %arg1: i32, %arg2: i32) -> (i32, i32, i32, i32) {
    %c0_i32 = arith.constant 0 : i32
    %c0_i32_0 = arith.constant 0 : i32
    return %arg0, %arg1, %arg2, %c0_i32 : i32, i32, i32, i32
  }
}

module attributes {stable_mosaic.version = 11 : i64} {
  func.func @_gcn_fused_kernel(%arg0: i32, %arg1: i32, %arg2: i32, %arg3: i32, %arg4: memref<4xi32, #tpu.memory_space<smem>>, %arg5: memref<4xi32, #tpu.memory_space<smem>>, %arg6: memref<1xf32, #tpu.memory_space<smem>>, %arg7: memref<1x1x16x32xf32, #tpu.memory_space<vmem>>, %arg8: memref<1x1x16x16xf32, #tpu.memory_space<vmem>>, %arg9: memref<1x32xf32, #tpu.memory_space<vmem>>, %arg10: memref<1x1x16x32xf32, #tpu.memory_space<vmem>>, %arg11: memref<1x1x1x32xf32, #tpu.memory_space<vmem>>, %arg12: memref<16x32xf32, #tpu.memory_space<vmem>>, %arg13: memref<1x32xf32, #tpu.memory_space<vmem>>) attributes {dimension_semantics = [#tpu.dimension_semantics<parallel>, #tpu.dimension_semantics<parallel>, #tpu.dimension_semantics<arbitrary>, #tpu.dimension_semantics<arbitrary>], iteration_bounds = array<i64: 4, 1, 1, 1>, scalar_prefetch = 2 : i64, scratch_operands = 2 : i64, tpu.core_type = #tpu.core_type<tc>, window_params = [{transform_indices = @transform_0, window_bounds = array<i64: 1>}, {transform_indices = @transform_1, window_bounds = array<i64: 1, 1, 16, 32>}, {transform_indices = @transform_2, window_bounds = array<i64: 1, 1, 16, 16>}, {pipeline_mode = #tpu.pipeline_mode<synchronous>, transform_indices = @transform_3, window_bounds = array<i64: 1, 32>}, {transform_indices = @transform_4, window_bounds = array<i64: 1, 1, 16, 32>}, {transform_indices = @transform_5, window_bounds = array<i64: 1, 1, 1, 32>}]} {
    %c0_i32 = arith.constant 0 : i32
    %0 = arith.cmpi eq, %arg3, %c0_i32 : i32
    %1 = arith.extui %0 : i1 to i32
    %c0_i32_0 = arith.constant 0 : i32
    %2 = arith.cmpi ne, %1, %c0_i32_0 : i32
    scf.if %2 {
      %cst_20 = arith.constant 0.000000e+00 : f32
      %24 = vector.broadcast %cst_20 : f32 to vector<16x32xf32>
      %c0_21 = arith.constant 0 : index
      %c0_22 = arith.constant 0 : index
      %25 = vector.load %arg12[%c0_21, %c0_22] : memref<16x32xf32, #tpu.memory_space<vmem>>, vector<16x32xf32>
      tpu.vector_store %arg12[%c0_21, %c0_22], %24 {strides = array<i32>} : memref<16x32xf32, #tpu.memory_space<vmem>>, vector<16x32xf32>,
    } else {
    }
    %c0_i32_1 = arith.constant 0 : i32
    %3 = arith.cmpi eq, %arg2, %c0_i32_1 : i32
    %c0_i32_2 = arith.constant 0 : i32
    %4 = arith.cmpi eq, %arg3, %c0_i32_2 : i32
    %5 = arith.andi %3, %4 : i1
    %6 = arith.extui %5 : i1 to i32
    %c0_i32_3 = arith.constant 0 : i32
    %7 = arith.cmpi ne, %6, %c0_i32_3 : i32
    scf.if %7 {
      %cst_20 = arith.constant 0.000000e+00 : f32
      %24 = vector.broadcast %cst_20 : f32 to vector<1x32xf32>
      %c0_21 = arith.constant 0 : index
      %c0_22 = arith.constant 0 : index
      %25 = vector.load %arg13[%c0_21, %c0_22] : memref<1x32xf32, #tpu.memory_space<vmem>>, vector<1x32xf32>
      tpu.vector_store %arg13[%c0_21, %c0_22], %24 {strides = array<i32>} : memref<1x32xf32, #tpu.memory_space<vmem>>, vector<1x32xf32>,
    } else {
    }
    %c0 = arith.constant 0 : index
    %c0_4 = arith.constant 0 : index
    %8 = vector.load %arg12[%c0, %c0_4] : memref<16x32xf32, #tpu.memory_space<vmem>>, vector<16x32xf32>
    %c0_5 = arith.constant 0 : index
    %c0_6 = arith.constant 0 : index
    %c0_7 = arith.constant 0 : index
    %c0_8 = arith.constant 0 : index
    %9 = vector.load %arg8[%c0_5, %c0_6, %c0_7, %c0_8] : memref<1x1x16x16xf32, #tpu.memory_space<vmem>>, vector<1x1x16x16xf32>
    %10 = vector.shape_cast %9 : vector<1x1x16x16xf32> to vector<16x16xf32>
    %c0_9 = arith.constant 0 : index
    %c0_10 = arith.constant 0 : index
    %c0_11 = arith.constant 0 : index
    %c0_12 = arith.constant 0 : index
    %11 = vector.load %arg7[%c0_9, %c0_10, %c0_11, %c0_12] : memref<1x1x16x32xf32, #tpu.memory_space<vmem>>, vector<1x1x16x32xf32>
    %12 = vector.shape_cast %11 : vector<1x1x16x32xf32> to vector<16x32xf32>
    %cst = arith.constant dense<0.000000e+00> : vector<16x32xf32>
    %13 = tpu.matmul %10, %12, %cst {dimension_numbers = #tpu.dot_dimension_numbers<[1], [0], [0], [1], [0, 0, 1, 1], [], []>} : vector<16x16xf32>, vector<16x32xf32>, vector<16x32xf32> -> vector<16x32xf32>
    %14 = arith.addf %8, %13 : vector<16x32xf32>
    %c0_13 = arith.constant 0 : index
    %c0_14 = arith.constant 0 : index
    %15 = vector.load %arg12[%c0_13, %c0_14] : memref<16x32xf32, #tpu.memory_space<vmem>>, vector<16x32xf32>
    tpu.vector_store %arg12[%c0_13, %c0_14], %14 {strides = array<i32>} : memref<16x32xf32, #tpu.memory_space<vmem>>, vector<16x32xf32>,
    %c0_i32_15 = arith.constant 0 : i32
    %16 = arith.cmpi eq, %arg3, %c0_i32_15 : i32
    %17 = arith.extui %16 : i1 to i32
    %c0_i32_16 = arith.constant 0 : i32
    %18 = arith.cmpi ne, %17, %c0_i32_16 : i32
    scf.if %18 {
      %c0_20 = arith.constant 0 : index
      %24 = memref.load %arg6[%c0_20] : memref<1xf32, #tpu.memory_space<smem>>
      %c0_21 = arith.constant 0 : index
      %c0_22 = arith.constant 0 : index
      %25 = vector.load %arg12[%c0_21, %c0_22] : memref<16x32xf32, #tpu.memory_space<vmem>>, vector<16x32xf32>
      %c0_23 = arith.constant 0 : index
      %c0_24 = arith.constant 0 : index
      %26 = vector.load %arg9[%c0_23, %c0_24] : memref<1x32xf32, #tpu.memory_space<vmem>>, vector<1x32xf32>
      %27 = vector.broadcast %26 : vector<1x32xf32> to vector<16x32xf32>
      %28 = arith.addf %25, %27 : vector<16x32xf32>
      %cst_25 = arith.constant 0.000000e+00 : f32
      %29 = vector.broadcast %cst_25 : f32 to vector<16x32xf32>
      %30 = arith.cmpf oge, %28, %29 : vector<16x32xf32>
      %31 = vector.broadcast %24 : f32 to vector<16x32xf32>
      %32 = arith.mulf %31, %28 : vector<16x32xf32>
      %33 = arith.select %30, %28, %32 : vector<16x32xi1>, vector<16x32xf32>
      %c0_26 = arith.constant 0 : index
      %c0_27 = arith.constant 0 : index
      %c0_28 = arith.constant 0 : index
      %c0_29 = arith.constant 0 : index
      %34 = vector.load %arg10[%c0_26, %c0_27, %c0_28, %c0_29] : memref<1x1x16x32xf32, #tpu.memory_space<vmem>>, vector<1x1x16x32xf32>
      %35 = vector.shape_cast %34 : vector<1x1x16x32xf32> to vector<16x32xf32>
      %36 = vector.shape_cast %33 : vector<16x32xf32> to vector<1x1x16x32xf32>
      tpu.vector_store %arg10[%c0_26, %c0_27, %c0_28, %c0_29], %36 {strides = array<i32>} : memref<1x1x16x32xf32, #tpu.memory_space<vmem>>, vector<1x1x16x32xf32>,
      %c0_30 = arith.constant 0 : index
      %c0_31 = arith.constant 0 : index
      %37 = vector.load %arg13[%c0_30, %c0_31] : memref<1x32xf32, #tpu.memory_space<vmem>>, vector<1x32xf32>
      %cst_32 = arith.constant dense<0.000000e+00> : vector<32xf32>
      %38 = vector.multi_reduction <add>, %33, %cst_32 [0] : vector<16x32xf32> to vector<32xf32>
      %39 = vector.shape_cast %38 : vector<32xf32> to vector<1x32xf32>
      %40 = arith.addf %37, %39 : vector<1x32xf32>
      %c0_33 = arith.constant 0 : index
      %c0_34 = arith.constant 0 : index
      %41 = vector.load %arg13[%c0_33, %c0_34] : memref<1x32xf32, #tpu.memory_space<vmem>>, vector<1x32xf32>
      tpu.vector_store %arg13[%c0_33, %c0_34], %40 {strides = array<i32>} : memref<1x32xf32, #tpu.memory_space<vmem>>, vector<1x32xf32>,
    } else {
    }
    %c0_i32_17 = arith.constant 0 : i32
    %19 = arith.cmpi eq, %arg2, %c0_i32_17 : i32
    %c0_i32_18 = arith.constant 0 : i32
    %20 = arith.cmpi eq, %arg3, %c0_i32_18 : i32
    %21 = arith.andi %19, %20 : i1
    %22 = arith.extui %21 : i1 to i32
    %c0_i32_19 = arith.constant 0 : i32
    %23 = arith.cmpi ne, %22, %c0_i32_19 : i32
    scf.if %23 {
      %c0_20 = arith.constant 0 : index
      %c0_21 = arith.constant 0 : index
      %24 = vector.load %arg13[%c0_20, %c0_21] : memref<1x32xf32, #tpu.memory_space<vmem>>, vector<1x32xf32>
      %cst_22 = arith.constant 6.250000e-02 : f32
      %25 = vector.broadcast %cst_22 : f32 to vector<1x32xf32>
      %26 = arith.mulf %24, %25 : vector<1x32xf32>
      %27 = arith.negf %26 : vector<1x32xf32>
      %28 = math.exp %27 : vector<1x32xf32>
      %cst_23 = arith.constant 1.000000e+00 : f32
      %29 = vector.broadcast %cst_23 : f32 to vector<1x32xf32>
      %30 = arith.addf %29, %28 : vector<1x32xf32>
      %31 = arith.divf %29, %30 : vector<1x32xf32>
      %c0_24 = arith.constant 0 : index
      %c0_25 = arith.constant 0 : index
      %c0_26 = arith.constant 0 : index
      %c0_27 = arith.constant 0 : index
      %32 = vector.load %arg11[%c0_24, %c0_25, %c0_26, %c0_27] : memref<1x1x1x32xf32, #tpu.memory_space<vmem>>, vector<1x1x1x32xf32>
      %33 = vector.shape_cast %32 : vector<1x1x1x32xf32> to vector<1x32xf32>
      %34 = vector.shape_cast %31 : vector<1x32xf32> to vector<1x1x1x32xf32>
      tpu.vector_store %arg11[%c0_24, %c0_25, %c0_26, %c0_27], %34 {strides = array<i32>} : memref<1x1x1x32xf32, #tpu.memory_space<vmem>>, vector<1x1x1x32xf32>,
    } else {
    }
    return
  }
  func.func @transform_0(%arg0: i32, %arg1: i32, %arg2: i32, %arg3: i32, %arg4: memref<4xi32, #tpu.memory_space<smem>>, %arg5: memref<4xi32, #tpu.memory_space<smem>>) -> i32 {
    %c0_i32 = arith.constant 0 : i32
    %c0_i32_0 = arith.constant 0 : i32
    return %c0_i32 : i32
  }
  func.func @transform_1(%arg0: i32, %arg1: i32, %arg2: i32, %arg3: i32, %arg4: memref<4xi32, #tpu.memory_space<smem>>, %arg5: memref<4xi32, #tpu.memory_space<smem>>) -> (i32, i32, i32, i32) {
    %0 = arith.index_cast %arg0 : i32 to index
    %1 = memref.load %arg4[%0] : memref<4xi32, #tpu.memory_space<smem>>
    %c0_i32 = arith.constant 0 : i32
    %c0_i32_0 = arith.constant 0 : i32
    return %1, %arg1, %arg3, %c0_i32 : i32, i32, i32, i32
  }
  func.func @transform_2(%arg0: i32, %arg1: i32, %arg2: i32, %arg3: i32, %arg4: memref<4xi32, #tpu.memory_space<smem>>, %arg5: memref<4xi32, #tpu.memory_space<smem>>) -> (i32, i32, i32, i32) {
    %0 = arith.index_cast %arg0 : i32 to index
    %1 = memref.load %arg5[%0] : memref<4xi32, #tpu.memory_space<smem>>
    %c0_i32 = arith.constant 0 : i32
    return %1, %arg1, %arg2, %arg3 : i32, i32, i32, i32
  }
  func.func @transform_3(%arg0: i32, %arg1: i32, %arg2: i32, %arg3: i32, %arg4: memref<4xi32, #tpu.memory_space<smem>>, %arg5: memref<4xi32, #tpu.memory_space<smem>>) -> (i32, i32) {
    %c0_i32 = arith.constant 0 : i32
    %c0_i32_0 = arith.constant 0 : i32
    %c0_i32_1 = arith.constant 0 : i32
    return %c0_i32, %c0_i32_0 : i32, i32
  }
  func.func @transform_4(%arg0: i32, %arg1: i32, %arg2: i32, %arg3: i32, %arg4: memref<4xi32, #tpu.memory_space<smem>>, %arg5: memref<4xi32, #tpu.memory_space<smem>>) -> (i32, i32, i32, i32) {
    %c0_i32 = arith.constant 0 : i32
    %c0_i32_0 = arith.constant 0 : i32
    return %arg0, %arg1, %arg2, %c0_i32 : i32, i32, i32, i32
  }
  func.func @transform_5(%arg0: i32, %arg1: i32, %arg2: i32, %arg3: i32, %arg4: memref<4xi32, #tpu.memory_space<smem>>, %arg5: memref<4xi32, #tpu.memory_space<smem>>) -> (i32, i32, i32, i32) {
    %c0_i32 = arith.constant 0 : i32
    %c0_i32_0 = arith.constant 0 : i32
    %c0_i32_1 = arith.constant 0 : i32
    return %arg0, %arg1, %c0_i32, %c0_i32_0 : i32, i32, i32, i32
  }
}

module attributes {stable_mosaic.version = 11 : i64} {
  func.func @_disc_kernel(%arg0: i32, %arg1: i32, %arg2: memref<1x3x32xf32, #tpu.memory_space<vmem>>, %arg3: memref<32x32xf32, #tpu.memory_space<vmem>>, %arg4: memref<4x1x16x32xf32, #tpu.memory_space<vmem>>, %arg5: memref<1x4x16xf32, #tpu.memory_space<vmem>>) attributes {dimension_semantics = [#tpu.dimension_semantics<parallel>, #tpu.dimension_semantics<parallel>], iteration_bounds = array<i64: 1, 1>, scalar_prefetch = 0 : i64, scratch_operands = 0 : i64, tpu.core_type = #tpu.core_type<tc>, window_params = [{transform_indices = @transform_0, window_bounds = array<i64: 1, 3, 32>}, {pipeline_mode = #tpu.pipeline_mode<synchronous>, transform_indices = @transform_1, window_bounds = array<i64: 32, 32>}, {transform_indices = @transform_2, window_bounds = array<i64: 4, 1, 16, 32>}, {transform_indices = @transform_3, window_bounds = array<i64: 1, 4, 16>}]} {
    %c0 = arith.constant 0 : index
    %c0_0 = arith.constant 0 : index
    %c0_1 = arith.constant 0 : index
    %0 = vector.load %arg2[%c0, %c0_0, %c0_1] : memref<1x3x32xf32, #tpu.memory_space<vmem>>, vector<1x3x32xf32>
    %1 = vector.shape_cast %0 : vector<1x3x32xf32> to vector<3x32xf32>
    %c0_2 = arith.constant 0 : index
    %c0_3 = arith.constant 0 : index
    %2 = vector.load %arg3[%c0_2, %c0_3] : memref<32x32xf32, #tpu.memory_space<vmem>>, vector<32x32xf32>
    %cst = arith.constant dense<0.000000e+00> : vector<3x32xf32>
    %3 = tpu.matmul %1, %2, %cst {dimension_numbers = #tpu.dot_dimension_numbers<[1], [0], [0], [1], [0, 0, 1, 1], [], []>} : vector<3x32xf32>, vector<32x32xf32>, vector<3x32xf32> -> vector<3x32xf32>
    %4 = vector.extract_strided_slice %3 {offsets = [0, 0], sizes = [1, 32], strides = [1, 1]} : vector<3x32xf32> to vector<1x32xf32>
    %5 = vector.extract_strided_slice %3 {offsets = [1, 0], sizes = [1, 32], strides = [1, 1]} : vector<3x32xf32> to vector<1x32xf32>
    %6 = arith.addf %4, %5 : vector<1x32xf32>
    %7 = vector.extract_strided_slice %3 {offsets = [2, 0], sizes = [1, 32], strides = [1, 1]} : vector<3x32xf32> to vector<1x32xf32>
    %c0_4 = arith.constant 0 : index
    %c0_5 = arith.constant 0 : index
    %c0_6 = arith.constant 0 : index
    %c0_7 = arith.constant 0 : index
    %8 = vector.load %arg4[%c0_4, %c0_5, %c0_6, %c0_7] : memref<4x1x16x32xf32, #tpu.memory_space<vmem>>, vector<1x1x16x32xf32>
    %9 = vector.shape_cast %8 : vector<1x1x16x32xf32> to vector<16x32xf32>
    %10 = vector.broadcast %6 : vector<1x32xf32> to vector<16x32xf32>
    %11 = arith.mulf %9, %10 : vector<16x32xf32>
    %cst_8 = arith.constant dense<0.000000e+00> : vector<16xf32>
    %12 = vector.multi_reduction <add>, %11, %cst_8 [1] : vector<16x32xf32> to vector<16xf32>
    %13 = vector.shape_cast %12 : vector<16xf32> to vector<1x16xf32>
    %c0_9 = arith.constant 0 : index
    %c0_10 = arith.constant 0 : index
    %c0_11 = arith.constant 0 : index
    %14 = vector.load %arg5[%c0_9, %c0_10, %c0_11] : memref<1x4x16xf32, #tpu.memory_space<vmem>>, vector<1x1x16xf32>
    %15 = vector.shape_cast %14 : vector<1x1x16xf32> to vector<1x16xf32>
    %16 = vector.shape_cast %13 : vector<1x16xf32> to vector<1x1x16xf32>
    tpu.vector_store %arg5[%c0_9, %c0_10, %c0_11], %16 {strides = array<i32>} : memref<1x4x16xf32, #tpu.memory_space<vmem>>, vector<1x1x16xf32>,
    %c1 = arith.constant 1 : index
    %c0_12 = arith.constant 0 : index
    %c0_13 = arith.constant 0 : index
    %c0_14 = arith.constant 0 : index
    %17 = vector.load %arg4[%c1, %c0_12, %c0_13, %c0_14] : memref<4x1x16x32xf32, #tpu.memory_space<vmem>>, vector<1x1x16x32xf32>
    %18 = vector.shape_cast %17 : vector<1x1x16x32xf32> to vector<16x32xf32>
    %19 = vector.broadcast %6 : vector<1x32xf32> to vector<16x32xf32>
    %20 = arith.mulf %18, %19 : vector<16x32xf32>
    %cst_15 = arith.constant dense<0.000000e+00> : vector<16xf32>
    %21 = vector.multi_reduction <add>, %20, %cst_15 [1] : vector<16x32xf32> to vector<16xf32>
    %22 = vector.shape_cast %21 : vector<16xf32> to vector<1x16xf32>
    %c0_16 = arith.constant 0 : index
    %c1_17 = arith.constant 1 : index
    %c0_18 = arith.constant 0 : index
    %23 = vector.load %arg5[%c0_16, %c1_17, %c0_18] : memref<1x4x16xf32, #tpu.memory_space<vmem>>, vector<1x1x16xf32>
    %24 = vector.shape_cast %23 : vector<1x1x16xf32> to vector<1x16xf32>
    %25 = vector.shape_cast %22 : vector<1x16xf32> to vector<1x1x16xf32>
    tpu.vector_store %arg5[%c0_16, %c1_17, %c0_18], %25 {strides = array<i32>} : memref<1x4x16xf32, #tpu.memory_space<vmem>>, vector<1x1x16xf32>,
    %c2 = arith.constant 2 : index
    %c0_19 = arith.constant 0 : index
    %c0_20 = arith.constant 0 : index
    %c0_21 = arith.constant 0 : index
    %26 = vector.load %arg4[%c2, %c0_19, %c0_20, %c0_21] : memref<4x1x16x32xf32, #tpu.memory_space<vmem>>, vector<1x1x16x32xf32>
    %27 = vector.shape_cast %26 : vector<1x1x16x32xf32> to vector<16x32xf32>
    %28 = vector.broadcast %7 : vector<1x32xf32> to vector<16x32xf32>
    %29 = arith.mulf %27, %28 : vector<16x32xf32>
    %cst_22 = arith.constant dense<0.000000e+00> : vector<16xf32>
    %30 = vector.multi_reduction <add>, %29, %cst_22 [1] : vector<16x32xf32> to vector<16xf32>
    %31 = vector.shape_cast %30 : vector<16xf32> to vector<1x16xf32>
    %c0_23 = arith.constant 0 : index
    %c2_24 = arith.constant 2 : index
    %c0_25 = arith.constant 0 : index
    %32 = vector.load %arg5[%c0_23, %c2_24, %c0_25] : memref<1x4x16xf32, #tpu.memory_space<vmem>>, vector<1x1x16xf32>
    %33 = vector.shape_cast %32 : vector<1x1x16xf32> to vector<1x16xf32>
    %34 = vector.shape_cast %31 : vector<1x16xf32> to vector<1x1x16xf32>
    tpu.vector_store %arg5[%c0_23, %c2_24, %c0_25], %34 {strides = array<i32>} : memref<1x4x16xf32, #tpu.memory_space<vmem>>, vector<1x1x16xf32>,
    %c3 = arith.constant 3 : index
    %c0_26 = arith.constant 0 : index
    %c0_27 = arith.constant 0 : index
    %c0_28 = arith.constant 0 : index
    %35 = vector.load %arg4[%c3, %c0_26, %c0_27, %c0_28] : memref<4x1x16x32xf32, #tpu.memory_space<vmem>>, vector<1x1x16x32xf32>
    %36 = vector.shape_cast %35 : vector<1x1x16x32xf32> to vector<16x32xf32>
    %37 = vector.broadcast %7 : vector<1x32xf32> to vector<16x32xf32>
    %38 = arith.mulf %36, %37 : vector<16x32xf32>
    %cst_29 = arith.constant dense<0.000000e+00> : vector<16xf32>
    %39 = vector.multi_reduction <add>, %38, %cst_29 [1] : vector<16x32xf32> to vector<16xf32>
    %40 = vector.shape_cast %39 : vector<16xf32> to vector<1x16xf32>
    %c0_30 = arith.constant 0 : index
    %c3_31 = arith.constant 3 : index
    %c0_32 = arith.constant 0 : index
    %41 = vector.load %arg5[%c0_30, %c3_31, %c0_32] : memref<1x4x16xf32, #tpu.memory_space<vmem>>, vector<1x1x16xf32>
    %42 = vector.shape_cast %41 : vector<1x1x16xf32> to vector<1x16xf32>
    %43 = vector.shape_cast %40 : vector<1x16xf32> to vector<1x1x16xf32>
    tpu.vector_store %arg5[%c0_30, %c3_31, %c0_32], %43 {strides = array<i32>} : memref<1x4x16xf32, #tpu.memory_space<vmem>>, vector<1x1x16xf32>,
    return
  }
  func.func @transform_0(%arg0: i32, %arg1: i32) -> (i32, i32, i32) {
    %c0_i32 = arith.constant 0 : i32
    %c0_i32_0 = arith.constant 0 : i32
    %c0_i32_1 = arith.constant 0 : i32
    return %arg0, %c0_i32, %c0_i32_0 : i32, i32, i32
  }
  func.func @transform_1(%arg0: i32, %arg1: i32) -> (i32, i32) {
    %c0_i32 = arith.constant 0 : i32
    %c0_i32_0 = arith.constant 0 : i32
    %c0_i32_1 = arith.constant 0 : i32
    return %c0_i32, %c0_i32_0 : i32, i32
  }
  func.func @transform_2(%arg0: i32, %arg1: i32) -> (i32, i32, i32, i32) {
    %c0_i32 = arith.constant 0 : i32
    %c0_i32_0 = arith.constant 0 : i32
    %c0_i32_1 = arith.constant 0 : i32
    return %c0_i32, %arg0, %arg1, %c0_i32_0 : i32, i32, i32, i32
  }
  func.func @transform_3(%arg0: i32, %arg1: i32) -> (i32, i32, i32) {
    %c0_i32 = arith.constant 0 : i32
    %c0_i32_0 = arith.constant 0 : i32
    return %arg0, %c0_i32, %arg1 : i32, i32, i32
  }
}

</mosaic_0001>

<bundles_post_ra>
// kernel: dgi_forward.3
= control target key start
LH: loop header
LB: loop body
LE: loop exit
PB: predicated region body
PF: predicated region fallthrough
CT: control target
= control target key end

     0   :  { %s500_s9 = smov 0   ;;  %s502_s10 = smov 0   ;;  %s533_s0 = inlined_call_operand.vmem [shape: f32[2,1,16,8], index: 0, kind: input, shape index: {}]   ;;  %s534_s1 = inlined_call_operand.vmem [shape: f32[8,32], index: 1, kind: input, shape index: {}]   ;;  %s535_s2 = inlined_call_operand.vmem [shape: f32[2,1,16,32], index: 2, kind: output, shape index: {}]  }
   0x1   :  { %s504_s11 = smov 0  }
   0x2 LB: > { %s31_s12 = sadd.s32 1, %s479_s10  ;;  %p418_p0 = scmp.ge.s32.totalorder %s483_s11, 1  ;;  %s483_s11 = sphi %s504_s11, %s12_s11   ;;  %s479_s10 = sphi %s502_s10, %s537_s10   ;;  %s475_s9 = sphi %s500_s9, %s536_s9  }
   0x3   : > { %p33_p1 = scmp.ge.s32.totalorder %s31_s12, 2  ;;  %p148_p2 = scmp.lt.s32.totalorder %s483_s11, 3 }
   0x5   : > { %s539_s12 = smov (%p33_p1, %s31_s12), 0  ;;  %p149_p3 = pnand %p418_p0, %p148_p2 }
   0x6   : > { %v216_v0 = vld [vmem:[%s534_s1] sm:$0xff] (!%p149_p3)  ;;  %p187_p4 = scmp.lt.s32.totalorder (!%p149_p3), %s475_s9, 1  ;;  %vm217_vm0 = vcmask (!%p149_p3), 64512   ;;  %vm299_vm1 = vcmask (!%p149_p3), 261120  }
   0x7   : > { %152 = sbr.rel (%p149_p3) target bundleno = 233 (0xe9), region = 28  ;;  %432 = vmatprep.subr.mxu0 (!%p149_p3), %v216_v0 }
   0x8   : > { %433 = vmatpush3.msra.mxu0 (!%p149_p3), %v216_v0 }
   0xe   : > { %s541_s9 = smov (!%p187_p4, %s475_s9), 1 }
   0xf   : > { %s427_s15 = sshll.u32 %s541_s9, 4 }
  0x10   : > { %s198_s18 = scalar_lea.vmem %s533_s0, %s427_s15  ;;  %s212_s21 = scalar_lea.vmem %s535_s2, %s427_s15 }
  0x11   : > { %v214_v1 = vld [vmem:[%s198_s18] sm:$0xff]  ;;  %v215_v2 = vld [vmem:[%s198_s18 + $0x8] sm:$0xff] }
  0x12   : > { %434 = vmatprep.mubr.msk.f32.mxu0 %vm217_vm0, %v214_v1 }
  0x13   : > { %435 = vmatmul.mubr.msk.f32.vlgmr.msra.gmra.mrb[0].mxu0 %vm217_vm0, %v215_v2 }
  0xe6   : > { %v436_v3 = vpop.f32.mrb[0].mxu0 }
  0xe7   : > { %301 = vst.msk [vmem:[%s212_s21 + $0x8] sm:$0xff] %vm299_vm1, %v436_v3  ;;  %v290_v4 = vpop.f32.mrb[1].mxu0 }
  0xe8   : > { %300 = vst.msk [vmem:[%s212_s21] sm:$0xff] %vm299_vm1, %v290_v4 }
  0xe9 PF: > { %s12_s11 = sadd.s32 1, %s483_s11   ;;  %s536_s9 = smov %s479_s10 }
  0xea   : > { %p9_p5 = scmp.ge.s32.totalorder %s12_s11, 4   ;;  %s537_s10 = smov %s539_s12 }
  0xec   :  { %11 = sbr.rel (!%p9_p5) target bundleno = 2 (0x2), region = 58 }

// kernel: dgi_forward.4
= control target key start
LH: loop header
LB: loop body
LE: loop exit
PB: predicated region body
PF: predicated region fallthrough
CT: control target
= control target key end

     0   :  { %s971_s0 = inlined_call_operand.vmem [shape: s32[4], index: 0, kind: input, shape index: {}]   ;;  %s972_s3 = inlined_call_operand.vmem [shape: f32[2,1,16,32], index: 3, kind: input, shape index: {}]   ;;  %s973_s4 = inlined_call_operand.vmem [shape: f32[3,1,16,16], index: 4, kind: input, shape index: {}]   ;;  %s974_s5 = inlined_call_operand.vmem [shape: f32[1,32], index: 5, kind: input, shape index: {}]   ;;  %s975_s6 = inlined_call_operand.vmem [shape: f32[4,1,16,32], index: 6, kind: output, shape index: {0}]   ;;  %s976_s7 = inlined_call_operand.vmem [shape: f32[4,1,1,32], index: 7, kind: output, shape index: {1}]   ;;  %s977_s1 = inlined_call_operand.vmem [shape: s32[4], index: 1, kind: input, shape index: {}]   ;;  %s978_s2 = inlined_call_operand.<no memory space> [shape: f32[1], index: 2, kind: input, shape index: {}]  }
   0x1   :  { %s13_s26 = sshll.u32 %s971_s0, 4  ;;  %s17_s29 = sshll.u32 %s977_s1, 4  ;;  %s14_s26 = int_to_ptr.vmem [resolvable:$true] %s13_s26  ;;  %s18_s29 = int_to_ptr.vmem [resolvable:$true] %s17_s29 }
   0x2   :  { %s806_s30 = scalar_lea.vmem %s14_s26, 16  ;;  %p811_p1 = scmp.lt.s32.totalorder %s14_s26, %s14_s26 }
   0x3   :  { %p807_p0 = scmp.ne.s32.totalorder %s14_s26, %s806_s30  ;;  %p812_p2 = scmp.lt.s32.totalorder %s806_s30, %s806_s30 }
   0x5   :  { %p813_p3 = por %p812_p2, %p811_p1 }
   0x7   :  { %p814_p4 = pnand %p813_p3, %p807_p0 }
   0x9   :  { %817 = shalt.err (!%p814_p4)  }
   0xa   :  { %s856_s8 = smov [#allocation5]   ;;  %s818_s9 = scalar_lea.vmem %s18_s29, 16 }
   0xb   :  { %16 = dma.vmem_to_smem %s14_s26, 16, %s856_s8, [#allocation4] }
   0xc   :  { %p819_p5 = scmp.ne.s32.totalorder %s18_s29, %s818_s9  ;;  %p823_p6 = scmp.lt.s32.totalorder %s18_s29, %s18_s29 }
   0xd   :  { %p824_p7 = scmp.lt.s32.totalorder %s818_s9, %s818_s9 }
   0xf   :  { %p825_p8 = por %p824_p7, %p823_p6 }
  0x11   :  { %p826_p9 = pnand %p825_p8, %p819_p5 }
  0x13   :  { %829 = shalt.err (!%p826_p9)  }
  0x14   :  { %s857_s0 = smov [#allocation6]   ;;  %21 = sst [smem:[#allocation7]] %s978_s2 }
  0x15   :  { %20 = dma.vmem_to_smem %s18_s29, 16, %s857_s0, [#allocation4] }
  0x16   :  { %842 = dma.done.wait [#allocation4], 32 }
  0x17   :  { %843 = vsyncadd [#allocation4], 4294967264 }
  0x18   :  { %23 = sfence }
  0x19   :  { %s908_s11 = smov 0   ;;  %s910_s12 = smov 0  }
  0x1a   :  { %s912_s13 = smov 0  }
  0x1b LB: > { %s55_s2 = sadd.s32 1, %s850_s12  ;;  %p744_p10 = scmp.ge.s32.totalorder %s854_s13, 1  ;;  %s854_s13 = sphi %s912_s13, %s29_s13   ;;  %s850_s12 = sphi %s910_s12, %s980_s12   ;;  %s846_s11 = sphi %s908_s11, %s979_s11  }
  0x1c   : > { %p57_p11 = scmp.ge.s32.totalorder %s55_s2, 4  ;;  %p284_p12 = scmp.lt.s32.totalorder %s854_s13, 5 }
  0x1e   : > { %s982_s2 = smov (%p57_p11, %s55_s2), 0  ;;  %p285_p13 = pnand %p744_p10, %p284_p12 }
  0x1f   : > { %s352_s14 = sld [smem:[#allocation5 + %s846_s11]] (!%p285_p13)  ;;  %vm411_vm0 = vcmask (!%p285_p13), 261120   ;;  %vm419_vm1 = vcmask (!%p285_p13), 253952   ;;  %v858_v0 = vmov (!%p285_p13), 0.0   ;;  %vm427_vm2 = vcmask (!%p285_p13), 130048   ;;  %p388_p2 = scmp.lt.s32.totalorder (!%p285_p13), %s846_s11, 3 }
  0x20   : > { %288 = sbr.rel (%p285_p13) target bundleno = 331 (0x14b), region = 36  ;;  %s368_s15 = sld [smem:[#allocation6 + %s846_s11]] (!%p285_p13)  ;;  %413 = vst.msk [vmem:[#allocation2 + $0x8] sm:$0xff] (!%p285_p13), %vm411_vm0, %v858_v0  ;;  %412 = vst.msk [vmem:[#allocation2] sm:$0xff] (!%p285_p13), %vm411_vm0, %v858_v0  ;;  %v753_v12 = vld [vmem:[%s974_s5] ss:$0 sm:$0xff] (!%p285_p13) }
  0x21   : > { %420 = vst.msk [vmem:[#allocation3] sm:$0x1] (!%p285_p13), %vm419_vm1, %v858_v0  ;;  %s517_s24 = sld [smem:[#allocation7]] (!%p285_p13) }
  0x25   : > { %p354_p0 = scmp.lt.s32.totalorder (!%p285_p13), %s352_s14, 1 }
  0x26   : > { %p370_p1 = scmp.lt.s32.totalorder (!%p285_p13), %s368_s15, 2 }
  0x27   : > { %s984_s14 = smov (!%p354_p0, %s352_s14), 1  ;;  %v422_v6 = vld [vmem:[#allocation2 + $0x8] sm:$0xff]  ;;  %v421_v7 = vld [vmem:[#allocation2] sm:$0xff]  ;;  %s988_s11 = smov (!%p388_p2, %s846_s11), 3  ;;  %v531_v14 = vstv %s517_s24 }
  0x28   : > { %s986_s15 = smov (!%p370_p1, %s368_s15), 2  ;;  %s757_s16 = sshll.u32 %s984_s14, 4  ;;  %v538_v30 = vld [vmem:[#allocation3] sm:$0x1] }
  0x29   : > { %s365_s19 = scalar_lea.vmem %s972_s3, %s757_s16  ;;  %s758_s20 = sshll.u32 %s986_s15, 4 }
  0x2a   : > { %v425_v1 = vld [vmem:[%s365_s19] sm:$0xff]  ;;  %v426_v2 = vld [vmem:[%s365_s19 + $0x8] sm:$0xff]  ;;  %s384_s23 = scalar_lea.vmem %s973_s4, %s758_s20  ;;  %s759_s27 = sshll.u32 %s988_s11, 4 }
  0x2b   : > { %v771_v3 = vpack.c.bf16 %v426_v2, %v425_v1  ;;  %v423_v4 = vld [vmem:[%s384_s23] sm:$0xff]  ;;  %v424_v5 = vld [vmem:[%s384_s23 + $0x8] sm:$0xff]  ;;  %s399_s30 = scalar_lea.vmem %s975_s6, %s759_s27  ;;  %s406_s0 = scalar_lea.vmem %s976_s7, %s988_s11 }
  0x2c   : > { %768 = vmatprep.mubr.msk.f32.mxu0 %vm427_vm2, %v423_v4 }
  0x2d   : > { %772 = vmatprep.subr.bf16.mxu0 %v771_v3 }
  0x2e   : > { %774 = vmatpush3.bf16.msra.mxu0 %v771_v3 }
  0x31   : > { %769 = vmatmul.mubr.msk.f32.vlgmr.msra.gmra.mrb[0].mxu0 %vm427_vm2, %v424_v5 }
 0x104   : > { %v770_v8 = vpop.f32.mrb[0].mxu0 }
 0x105   : > { %v510_v9 = vadd.f32 %v770_v8, %v422_v6  ;;  %v500_v10 = vpop.f32.mrb[1].mxu0 }
 0x106   : > { %v509_v11 = vadd.f32 %v500_v10, %v421_v7 }
 0x107   : > { %513 = vst.msk [vmem:[#allocation2 + $0x8] sm:$0xff] %vm411_vm0, %v510_v9 }
 0x108   : > { %512 = vst.msk [vmem:[#allocation2] sm:$0xff] %vm411_vm0, %v509_v11 }
 0x10e   : > { %v519_v13 = vld [vmem:[#allocation2 + $0x8] sm:$0xff] }
 0x10f   : > { %v528_v15 = vadd.f32 %v753_v12, %v519_v13  ;;  %v518_v16 = vld [vmem:[#allocation2] sm:$0xff] }
 0x110   : > { %v527_v17 = vadd.f32 %v753_v12, %v518_v16 }
 0x111   : > { %vm530_vm3 = vcmp.ge.f32.partialorder %v528_v15, 0.0  ;;  %v533_v18 = vmul.f32 %v531_v14, %v528_v15 }
 0x112   : > { %vm529_vm4 = vcmp.ge.f32.partialorder %v527_v17, 0.0  ;;  %v532_v19 = vmul.f32 %v531_v14, %v527_v17 }
 0x113   : > { %v535_v20 = vsel %vm530_vm3, %v528_v15, %v533_v18 }
 0x114   : > { %537 = vst.msk [vmem:[%s399_s30 + $0x8] sm:$0xff] %vm411_vm0, %v535_v20  ;;  %v540_v21 = vsel %vm411_vm0, %v535_v20, 0.0  ;;  %v534_v22 = vsel %vm529_vm4, %v527_v17, %v532_v19 }
 0x115   : > { %536 = vst.msk [vmem:[%s399_s30] sm:$0xff] %vm411_vm0, %v534_v22  ;;  %v539_v23 = vsel %vm411_vm0, %v534_v22, 0.0 }
 0x116   : > { %v541_v24 = vadd.f32 %v540_v21, %v539_v23 }
 0x118   : > { %v542_v25 = vrot.slane %v541_v24, 4 }
 0x11a   : > { %v543_v26 = vadd.f32 %v542_v25, %v541_v24 }
 0x11c   : > { %v544_v27 = vrot.slane %v543_v26, 2 }
 0x11e   : > { %v545_v28 = vadd.f32 %v544_v27, %v543_v26 }
 0x120   : > { %v546_v29 = vrot.slane %v545_v28, 1 }
 0x122   : > { %v547_v31 = vadd.f32 %v546_v29, %v545_v28 }
 0x124   : > { %v548_v32 = vadd.f32 %v547_v31, %v538_v30 }
 0x126   : > { %550 = vst.msk [vmem:[#allocation3] sm:$0x1] %vm419_vm1, %v548_v32 }
 0x12d   : > { %v553_v33 = vld [vmem:[#allocation3] sm:$0x1] }
 0x12e   : > { %v754_v34 = vmul.f32 -0.0625, %v553_v33 }
 0x130   : > { %v556_v35 = vmul.f32 1.442695, %v754_v34 }
 0x132   : > { %802 = vpow2.f32 %v556_v35 }
 0x13c   : > { %v803_v36 = vpop.eup %802 }
 0x13d   : > { %v558_v37 = vadd.f32 1.0, %v803_v36 }
 0x13f   : > { %804 = vrcp.f32 %v558_v37 }
 0x149   : > { %v805_v38 = vpop.eup %804 }
 0x14a   : > { %562 = vst.msk [vmem:[%s406_s0] sm:$0x1] %vm419_vm1, %v805_v38 }
 0x14b PF: > { %s29_s13 = sadd.s32 1, %s854_s13   ;;  %s979_s11 = smov %s850_s12 }
 0x14c   : > { %p26_p3 = scmp.ge.s32.totalorder %s29_s13, 6   ;;  %s980_s12 = smov %s982_s2 }
 0x14e   :  { %28 = sbr.rel (!%p26_p3) target bundleno = 27 (0x1b), region = 97 }

// kernel: dgi_forward.5
= control target key start
LH: loop header
LB: loop body
LE: loop exit
PB: predicated region body
PF: predicated region fallthrough
CT: control target
= control target key end

     0   :  { %v241_v0 = vmov 0.0|0.0   ;;  %vm242_vm0 = vmmov 0   ;;  %v243_v4 = vmov 0.0   ;;  %vm19_vm1 = vcmask 261120   ;;  %s332_s1 = inlined_call_operand.vmem [shape: f32[32,32], index: 1, kind: input, shape index: {}]   ;;  %s333_s0 = inlined_call_operand.vmem [shape: f32[1,3,32], index: 0, kind: input, shape index: {}]   ;;  %s334_s2 = inlined_call_operand.vmem [shape: f32[4,1,16,32], index: 2, kind: input, shape index: {}]   ;;  %s335_s3 = inlined_call_operand.vmem [shape: f32[1,4,16], index: 3, kind: output, shape index: {}]  }
   0x1   :  { %232 = vmatprep.subr.bf16.mxu0 %v241_v0  ;;  %v15_v1 = vld [vmem:[%s332_s1] sm:$0xff]  ;;  %v16_v2 = vld [vmem:[%s332_s1 + $0x8] sm:$0xff]  ;;  %v17_v3 = vld [vmem:[%s332_s1 + $0x10] sm:$0xff]  ;;  %229 = vmatprep.mubr.msk.f32.mxu0 %vm242_vm0, %v243_v4  ;;  %v99_v9 = vlaneseq  ;;  %vm124_vm2 = vcmask 130112   ;;  %vm127_vm3 = vcmask 122880  }
   0x2   :  { %v233_v5 = vpack.c.bf16 %v16_v2, %v15_v1  ;;  %v18_v6 = vld [vmem:[%s332_s1 + $0x18] sm:$0xff]  ;;  %v14_v8 = vld [vmem:[%s333_s0] sm:$0x7]  ;;  %v213_v13 = vld [vmem:[%s334_s2 + $0x28] sm:$0xff] }
   0x3   :  { %v236_v7 = vpack.c.bf16 %v18_v6, %v17_v3  ;;  %v100_v10 = vshrl.u32 %v99_v9, 7  ;;  %v212_v14 = vld [vmem:[%s334_s2 + $0x20] sm:$0xff]  ;;  %v210_v22 = vld [vmem:[%s334_s2 + $0x10] sm:$0xff]  ;;  %v211_v27 = vld [vmem:[%s334_s2 + $0x18] sm:$0xff]  ;;  %v114_v43 = vand.u32 127, %v99_v9 }
   0x4   :  { %234 = vmatpush3.bf16.msra.mxu0 %v233_v5  ;;  %v97_v23 = vld [vmem:[%s334_s2] sm:$0xff]  ;;  %v98_v28 = vld [vmem:[%s334_s2 + $0x8] sm:$0xff]  ;;  %v215_v35 = vld [vmem:[%s334_s2 + $0x38] sm:$0xff] }
   0x5   :  { %235 = vmatprep.subr.bf16.mxu0 %v241_v0  ;;  %v158_v11 = vsub.s32 2, %v100_v10  ;;  %v101_v16 = vsub.s32 0, %v100_v10  ;;  %v214_v36 = vld [vmem:[%s334_s2 + $0x30] sm:$0xff]  ;;  %v119_v44 = vadd.s32 4294967288, %v114_v43  ;;  %v117_v46 = vsub.s32 %v114_v43, %v100_v10 }
   0x7   :  { %v122_v45 = vsub.s32 %v119_v44, %v100_v10 }
   0x8   :  { %237 = vmatpush3.bf16.msra.mxu0 %v236_v7 }
   0xb   :  { %230 = vmatmul.mubr.msk.f32.vlgmr.msra.gmra.mrb[0].mxu0 %vm19_vm1, %v14_v8 }
  0xde   :  { %v89_v12 = vpop.f32.mrb[0].mxu0 }
  0xdf   :  { %v94_v15 = vrot.slane %v89_v12, 1  ;;  %v159_v17 = vrot.slane %v89_v12, %v158_v11  ;;  %v231_v18 = vpop.f32.mrb[1].mxu0 }
  0xe1   :  { %v96_v19 = vadd.f32 %v94_v15, %v89_v12  ;;  %v161_v20 = vmul.f32 %v213_v13, %v159_v17  ;;  %v160_v21 = vmul.f32 %v212_v14, %v159_v17  ;;  %v185_v39 = vmul.f32 %v215_v35, %v159_v17 }
  0xe2   :  { %v184_v40 = vmul.f32 %v214_v36, %v159_v17 }
  0xe3   :  { %v102_v24 = vrot.slane %v96_v19, %v101_v16  ;;  %v165_v25 = vsel %vm19_vm1, %v161_v20, 0.0  ;;  %v162_v26 = vsel %vm19_vm1, %v160_v21, 0.0  ;;  %v189_v41 = vsel %vm19_vm1, %v185_v39, 0.0 }
  0xe4   :  { %166 = vadd.xlane.f32.xlu1 %v165_v25  ;;  %163 = vadd.xlane.f32.xlu0 %v162_v26  ;;  %v186_v42 = vsel %vm19_vm1, %v184_v40, 0.0 }
  0xe5   :  { %v132_v29 = vmul.f32 %v210_v22, %v102_v24  ;;  %v103_v30 = vmul.f32 %v102_v24, %v97_v23  ;;  %v133_v33 = vmul.f32 %v211_v27, %v102_v24  ;;  %v104_v34 = vmul.f32 %v102_v24, %v98_v28 }
  0xe7   :  { %v134_v31 = vsel %vm19_vm1, %v132_v29, 0.0  ;;  %v105_v32 = vsel %vm19_vm1, %v103_v30, 0.0  ;;  %v137_v37 = vsel %vm19_vm1, %v133_v33, 0.0  ;;  %v108_v38 = vsel %vm19_vm1, %v104_v34, 0.0 }
  0xe8   :  { %135 = vadd.xlane.f32.xlu1 %v134_v31  ;;  %106 = vadd.xlane.f32.xlu0 %v105_v32 }
  0xec   :  { %138 = vadd.xlane.f32.xlu1 %v137_v37  ;;  %109 = vadd.xlane.f32.xlu0 %v108_v38 }
  0xf0   :  { %190 = vadd.xlane.f32.xlu1 %v189_v41  ;;  %187 = vadd.xlane.f32.xlu0 %v186_v42 }
 0x171   :  { %v167_v47 = vpop.xlane.xlu1 %166  ;;  %v164_v48 = vpop.xlane.xlu0 %163 }
 0x172   :  { %v177_v49 = vrot.slane %v167_v47, %v122_v45  ;;  %v173_v50 = vrot.slane %v164_v48, %v117_v46 }
 0x174   :  { %v178_v51 = vsel %vm124_vm2, %v177_v49, %v173_v50 }
 0x175   :  { %180 = vst.msk [vmem:[%s335_s3 + $0x2] sm:$0x1] %vm127_vm3, %v178_v51  ;;  %v136_v52 = vpop.xlane.xlu1 %135  ;;  %v107_v53 = vpop.xlane.xlu0 %106 }
 0x176   :  { %v145_v56 = vrot.slane %v136_v52, %v117_v46  ;;  %v118_v57 = vrot.slane %v107_v53, %v117_v46 }
 0x179   :  { %v139_v54 = vpop.xlane.xlu1 %138  ;;  %v110_v55 = vpop.xlane.xlu0 %109 }
 0x17a   :  { %v149_v58 = vrot.slane %v139_v54, %v122_v45  ;;  %v123_v59 = vrot.slane %v110_v55, %v122_v45 }
 0x17c   :  { %v150_v60 = vsel %vm124_vm2, %v149_v58, %v145_v56  ;;  %v125_v61 = vsel %vm124_vm2, %v123_v59, %v118_v57 }
 0x17d   :  { %152 = vst.msk [vmem:[%s335_s3 + $0x1] sm:$0x1] %vm127_vm3, %v150_v60  ;;  %128 = vst.msk [vmem:[%s335_s3] sm:$0x1] %vm127_vm3, %v125_v61  ;;  %v191_v62 = vpop.xlane.xlu1 %190  ;;  %v188_v63 = vpop.xlane.xlu0 %187 }
 0x17e   :  { %v201_v0 = vrot.slane %v191_v62, %v122_v45  ;;  %v197_v1 = vrot.slane %v188_v63, %v117_v46 }
 0x180   :  { %v202_v2 = vsel %vm124_vm2, %v201_v0, %v197_v1 }
 0x181   :  { %204 = vst.msk [vmem:[%s335_s3 + $0x3] sm:$0x1] %vm127_vm3, %v202_v2 }

</bundles_post_ra>
